<compile_context>
chip_gen: v7x
topology: tpu7x:2x2x1
jax: 0.10.0
libtpu: 0.0.40
codegen_flags: <defaults>
</compile_context>

<pallas_src>
import functools
import math

import jax
import jax.numpy as jnp
from jax import lax
from jax.experimental import pallas as pl
from jax.experimental.pallas import tpu as pltpu

_LANE = 128


# ---------------------------------------------------------------------------
# Small helpers
# ---------------------------------------------------------------------------
def _round_up(x, m):
    return (x + m - 1) // m * m


def _pick_block(s, preferred):
    for cand in (preferred, 1024, 512, 256, 128, 64, 32, 16, 8):
        if cand <= s and s % cand == 0:
            return cand
    return s  # falls back to the full (sublane-padded) extent


def _pick_tn(d_in, n_out, itemsize, budget=8 * 1024 * 1024):
    """Largest tile of the projection's output dim whose (double-buffered)
    weight tile stays within `budget` bytes (v7x-safe at large D)."""
    for cand in (n_out, 2048, 1024, 512, 384, 256, 128):
        if cand <= n_out and n_out % cand == 0 and 2 * d_in * cand * itemsize <= budget:
            return cand
    return 128 if n_out % 128 == 0 else n_out


def _vmem_limit_bytes(estimate_bytes):
    # Generation-aware scoped-VMEM limit: ~85% of physical VMEM per core
    # (~108 MiB on v5e/v6e, ~54 MiB on v7x), never below the 32 MiB default.
    try:
        cap = int(getattr(pltpu.get_tpu_info(), "vmem_capacity_bytes",
                          64 * 1024 * 1024))
    except Exception:  # pragma: no cover - conservative fallback
        cap = 64 * 1024 * 1024
    ceiling = int(cap * 0.85)
    return int(max(32 * 1024 * 1024, min(ceiling, 4 * int(estimate_bytes))))


def _compiler_params(dimension_semantics, vmem_estimate_bytes):
    return pltpu.CompilerParams(
        dimension_semantics=dimension_semantics,
        vmem_limit_bytes=_vmem_limit_bytes(vmem_estimate_bytes),
    )


def _buffered_spec(shape, index_map, depth):
    """BlockSpec with requested pipeline depth; falls back to default 2-deep
    buffering if this JAX build lacks pipeline_mode/Buffered."""
    try:
        return pl.BlockSpec(shape, index_map, pipeline_mode=pl.Buffered(depth))
    except Exception:  # pragma: no cover
        return pl.BlockSpec(shape, index_map)


def _newton_reciprocal(x):
    # EUP approximate reciprocal (free slot) + one Newton step -> ~f32 accuracy.
    inv = pl.reciprocal(x, approx=True)
    return inv * (2.0 - x * inv)


def _fuse_qkv_params(wq, wk, wv, bq, bk, bv, scale):
    """torch.nn.Linear stores W as (out, in), y = x @ W.T + b.  Pre-transpose
    once, fuse Q/K/V into a single (D, 3D) weight / (1, 3D) bias, and fold the
    1/sqrt(D) softmax scale into the Q slice."""
    d = wq.shape[0]
    w_qkv = jnp.concatenate([wq.T * scale, wk.T, wv.T], axis=1)          # (D, 3D)
    b_qkv = jnp.concatenate([bq * scale, bk, bv], axis=0).reshape(1, 3 * d)
    return w_qkv, b_qkv


# ---------------------------------------------------------------------------
# Small-problem path: whole (B, S, D) problem in ONE grid step
# ---------------------------------------------------------------------------
def _fused_attention_kernel(x_ref, w_ref, b_ref, o_ref, *, matmul_dtype):
    B, S, D = x_ref.shape

    # Fold batch into the sublane dim -> one wide (B*S, D) @ (D, 3D) matmul.
    x2 = x_ref[...].reshape(B * S, D).astype(matmul_dtype)
    qkv = jnp.dot(x2, w_ref[...], preferred_element_type=jnp.float32) + b_ref[...]
    qkv = qkv.reshape(B, S, 3 * D)
    q = qkv[:, :, :D]          # scale already folded into the Q weights/bias
    k = qkv[:, :, D:2 * D]
    v = qkv[:, :, 2 * D:]

    # Batched q @ k^T without materializing a transposed copy of K.
    s = lax.dot_general(q.astype(matmul_dtype), k.astype(matmul_dtype),
                        (((2,), (2,)), ((0,), (0,))),
                        preferred_element_type=jnp.float32)          # (B, S, S)

    # Numerically stable softmax in f32.
    m = jnp.max(s, axis=-1, keepdims=True)
    e = jnp.exp(s - m)
    denom = jnp.sum(e, axis=-1, keepdims=True)
    w_att = e * _newton_reciprocal(denom)

    out = lax.dot_general(w_att.astype(matmul_dtype), v.astype(matmul_dtype),
                          (((2,), (1,)), ((0,), (0,))),
                          preferred_element_type=jnp.float32)        # (B, S, D)
    o_ref[...] = out.astype(o_ref.dtype)


def _attention_small(x, w_qkv, b_qkv, *, matmul_dtype):
    B, S, D = x.shape
    est = (x.size * 4 + w_qkv.size * w_qkv.dtype.itemsize + b_qkv.size * 4
           + B * S * 3 * D * 4 + B * S * S * 4 + B * S * D * 4)
    kernel = functools.partial(_fused_attention_kernel, matmul_dtype=matmul_dtype)
    return pl.pallas_call(
        kernel,
        out_shape=jax.ShapeDtypeStruct((B, S, D), x.dtype),
        grid_spec=pltpu.PrefetchScalarGridSpec(
            num_scalar_prefetch=0,
            grid=(1,),                         # single step: no per-step overhead
            in_specs=[
                pl.BlockSpec((B, S, D), lambda i: (0, 0, 0)),        # x
                pl.BlockSpec((D, 3 * D), lambda i: (0, 0)),          # fused W
                pl.BlockSpec((1, 3 * D), lambda i: (0, 0)),          # fused b
            ],
            out_specs=pl.BlockSpec((B, S, D), lambda i: (0, 0, 0)),
        ),
        compiler_params=_compiler_params(("arbitrary",), est),
    )(x, w_qkv, b_qkv)


# ---------------------------------------------------------------------------
# Large path: K/V projection kernel + flash attention kernel with fused Q proj
# ---------------------------------------------------------------------------
def _kv_projection_kernel(x_ref, w_ref, b_ref, kv_ref, *, matmul_dtype):
    x = x_ref[...].astype(matmul_dtype)              # (tm, Dp)
    out = jnp.dot(x, w_ref[...], preferred_element_type=jnp.float32) + b_ref[...]
    kv_ref[...] = out.astype(kv_ref.dtype)           # stored in matmul_dtype


def _flash_attention_kernel(x_ref, wq_ref, bq_ref, k_ref, v_ref, o_ref,
                            q_sc, m_sc, l_sc, acc_sc, *, matmul_dtype):
    kv_step = pl.program_id(2)

    @pl.when(kv_step == 0)
    def _():
        # Fused Q projection, once per (batch, q-tile).  The 1/sqrt(D) scale is
        # already folded into wq/bq, so the score matmul needs no rescale.
        xq = x_ref[0].astype(matmul_dtype)                       # (tq, Dp)
        q = jnp.dot(xq, wq_ref[...], preferred_element_type=jnp.float32)
        q_sc[...] = (q + bq_ref[...]).astype(matmul_dtype)
        m_sc[...] = jnp.full(m_sc.shape, -jnp.inf, dtype=m_sc.dtype)
        l_sc[...] = jnp.zeros(l_sc.shape, dtype=l_sc.dtype)
        acc_sc[...] = jnp.zeros(acc_sc.shape, dtype=acc_sc.dtype)

    q = q_sc[...]                                                # (tq, Dp)
    k = k_ref[0]                                                 # (tk, Dp) matmul_dtype
    v = v_ref[0]                                                 # (tk, Dp) matmul_dtype

    s = lax.dot_general(q, k, (((1,), (1,)), ((), ())),
                        preferred_element_type=jnp.float32)      # (tq, tk)

    m_prev = m_sc[...]
    m_new = jnp.maximum(m_prev, jnp.max(s, axis=-1, keepdims=True))
    alpha = jnp.exp(m_prev - m_new)
    p = jnp.exp(s - m_new)
    l_sc[...] = alpha * l_sc[...] + jnp.sum(p, axis=-1, keepdims=True)
    acc_sc[...] = alpha * acc_sc[...] + jnp.dot(
        p.astype(matmul_dtype), v, preferred_element_type=jnp.float32)
    m_sc[...] = m_new

    @pl.when(kv_step == pl.num_programs(2) - 1)
    def _():
        o_ref[0] = (acc_sc[...] * _newton_reciprocal(l_sc[...])).astype(o_ref.dtype)


def _attention_flash(x, wq, wk, wv, bq, bk, bv, *, scale, matmul_dtype,
                     block_q, block_k):
    B, S, D = x.shape
    out_dtype = x.dtype
    itemsize = jnp.dtype(matmul_dtype).itemsize

    # Zero-pad the feature dim to a lane multiple (exact; see module docstring).
    Dp = _round_up(D, _LANE)
    if Dp != D:
        pad = Dp - D
        x = jnp.pad(x, ((0, 0), (0, 0), (0, pad)))
        wq, wk, wv = (jnp.pad(w, ((0, pad), (0, pad))) for w in (wq, wk, wv))
        bq, bk, bv = (jnp.pad(b, ((0, pad),)) for b in (bq, bk, bv))

    # One-time parameter prep (hoisted out of the kernels).
    wq_t = (wq.T * scale).astype(matmul_dtype)                    # (Dp, Dp)
    bq_r = (bq * scale).reshape(1, Dp)                            # f32 bias
    w_kv = jnp.concatenate([wk.T, wv.T], axis=1).astype(matmul_dtype)  # (Dp, 2Dp)
    b_kv = jnp.concatenate([bk, bv], axis=0).reshape(1, 2 * Dp)

    # 1) K/V projection, output kept in matmul_dtype (halves K/V HBM traffic
    #    when bf16).  The 2Dp output dim is tiled so the weight tile stays
    #    small on v7x's 64 MiB VMEM.
    x2 = x.reshape(B * S, Dp)
    tm = _pick_block(B * S, 512)
    tn = _pick_tn(Dp, 2 * Dp, itemsize)
    proj_est = tm * Dp * 4 + Dp * tn * itemsize + tn * 4 + tm * tn * itemsize
    kv = pl.pallas_call(
        functools.partial(_kv_projection_kernel, matmul_dtype=matmul_dtype),
        out_shape=jax.ShapeDtypeStruct((B * S, 2 * Dp), matmul_dtype),
        grid_spec=pltpu.PrefetchScalarGridSpec(
            num_scalar_prefetch=0,
            grid=(B * S // tm, 2 * Dp // tn),
            in_specs=[
                pl.BlockSpec((tm, Dp), lambda i, j: (i, 0)),       # x
                pl.BlockSpec((Dp, tn), lambda i, j: (0, j)),       # W_kv tile
                pl.BlockSpec((1, tn), lambda i, j: (0, j)),        # b_kv tile
            ],
            out_specs=pl.BlockSpec((tm, tn), lambda i, j: (i, j)),
        ),
        compiler_params=_compiler_params(("parallel", "parallel"), proj_est),
    )(x2, w_kv, b_kv)
    kv = kv.reshape(B, S, 2 * Dp)

    # 2) Flash attention with the Q projection fused into the kernel.
    attn_est = (block_q * Dp * (4 + 4)                # x tile + out tile (f32)
                + Dp * Dp * itemsize                  # Wq
                + 3 * 2 * block_k * Dp * itemsize     # K, V (3-deep buffers)
                + block_q * Dp * (itemsize + 4)       # q scratch + accumulator
                + block_q * block_k * 4)              # score temp
    grid = (B, S // block_q, S // block_k)
    kernel = functools.partial(_flash_attention_kernel, matmul_dtype=matmul_dtype)
    out = pl.pallas_call(
        kernel,
        out_shape=jax.ShapeDtypeStruct((B, S, Dp), out_dtype),
        grid_spec=pltpu.PrefetchScalarGridSpec(
            num_scalar_prefetch=0,
            grid=grid,
            in_specs=[
                pl.BlockSpec((1, block_q, Dp), lambda b, qi, ki: (b, qi, 0)),   # x (for Q)
                pl.BlockSpec((Dp, Dp), lambda b, qi, ki: (0, 0)),               # Wq (scaled)
                pl.BlockSpec((1, Dp), lambda b, qi, ki: (0, 0)),                # bq (scaled)
                _buffered_spec((1, block_k, Dp), lambda b, qi, ki: (b, ki, 0), 3),  # K
                _buffered_spec((1, block_k, Dp), lambda b, qi, ki: (b, ki, 1), 3),  # V
            ],
            out_specs=pl.BlockSpec((1, block_q, Dp), lambda b, qi, ki: (b, qi, 0)),
            scratch_shapes=[
                pltpu.VMEM((block_q, Dp), matmul_dtype),   # projected Q tile
                pltpu.VMEM((block_q, 1), jnp.float32),     # running max
                pltpu.VMEM((block_q, 1), jnp.float32),     # running denom
                pltpu.VMEM((block_q, Dp), jnp.float32),    # output accumulator
            ],
        ),
        compiler_params=_compiler_params(
            ("parallel", "parallel", "arbitrary"), attn_est),
    )(x, wq_t, bq_r, kv, kv)

    if Dp != D:
        out = out[..., :D]
    return out


# ---------------------------------------------------------------------------
# Public wrapper
# ---------------------------------------------------------------------------
def attention_layer(x, wq, wk, wv, bq, bk, bv, *,
                    matmul_dtype=jnp.bfloat16, block_q=None, block_k=None):
    """Pallas AttentionLayer forward.  x: (B, S, D); w*: (D, D) torch layout;
    b*: (D,).  matmul_dtype controls MXU operand precision (bf16 default;
    accumulation / bias / softmax stay f32).  block_q/block_k force the
    flash-tiled path."""
    B, S, D = x.shape
    scale = 1.0 / math.sqrt(D)

    tiles_requested = block_q is not None or block_k is not None
    small_bytes = 4 * B * S * (S + 4 * D)       # un-tiled intermediates, f32
    if not tiles_requested and small_bytes <= 2 * 1024 * 1024:
        w_qkv, b_qkv = _fuse_qkv_params(wq, wk, wv, bq, bk, bv, scale)
        return _attention_small(x, w_qkv.astype(matmul_dtype), b_qkv,
                                matmul_dtype=matmul_dtype)

    if block_q is None:
        block_q = _pick_block(S, 512)
    if block_k is None:
        block_k = _pick_block(S, 1024)
    return _attention_flash(x, wq, wk, wv, bq, bk, bv, scale=scale,
                            matmul_dtype=matmul_dtype,
                            block_q=block_q, block_k=block_k)


# ---------------------------------------------------------------------------
# Pure-JAX reference (matches the PyTorch forward)
# ---------------------------------------------------------------------------
def attention_layer_ref(x, wq, wk, wv, bq, bk, bv):
    D = x.shape[-1]
    hp = jax.lax.Precision.HIGHEST
    Q = jnp.einsum("bsd,od->bso", x, wq, precision=hp) + bq
    K = jnp.einsum("bsd,od->bso", x, wk, precision=hp) + bk
    V = jnp.einsum("bsd,od->bso", x, wv, precision=hp) + bv
    scores = jnp.einsum("bqd,bkd->bqk", Q, K, precision=hp) / math.sqrt(D)
    w = jax.nn.softmax(scores, axis=-1)
    return jnp.einsum("bqk,bkd->bqd", w, V, precision=hp)


def _make_inputs(key, B, S, D):
    kx, kwq, kwk, kwv, kbq, kbk, kbv = jax.random.split(key, 7)
    bound = 1.0 / math.sqrt(D)
    u = lambda k, shape: jax.random.uniform(k, shape, jnp.float32, -bound, bound)
    x = jax.random.normal(kx, (B, S, D), dtype=jnp.float32)
    return (x, u(kwq, (D, D)), u(kwk, (D, D)), u(kwv, (D, D)),
            u(kbq, (D,)), u(kbk, (D,)), u(kbv, (D,)))


if __name__ == "__main__":
    key = jax.random.PRNGKey(0)
    k1, k2, k3 = jax.random.split(key, 3)

    # 1) Module-spec tiny shape, f32 MXU operands (tight check).
    B, S, D = 2, 8, 32
    args = _make_inputs(k1, B, S, D)
    ref = attention_layer_ref(*args)
    out = jax.block_until_ready(attention_layer(*args, matmul_dtype=jnp.float32))
    assert out.shape == (B, S, D)
    err = float(jnp.max(jnp.abs(out - ref)))
    assert err < 1e-4, f"small/f32 path max abs err {err}"

    # 2) Same shape, default bf16 MXU operands (looser tolerance).
    out_bf = jax.block_until_ready(attention_layer(*args))
    err = float(jnp.max(jnp.abs(out_bf - ref)))
    assert err < 5e-2, f"small/bf16 path max abs err {err}"

    # 3) Flash-tiled path: fused Q projection, bf16 K/V intermediate,
    #    multiple q tiles and kv steps.
    B2, S2, D2 = 2, 256, 128
    args2 = _make_inputs(k2, B2, S2, D2)
    ref2 = attention_layer_ref(*args2)
    out2 = jax.block_until_ready(attention_layer(*args2, block_q=128, block_k=64))
    err = float(jnp.max(jnp.abs(out2 - ref2)))
    assert err < 5e-2, f"flash path max abs err {err}"

    # 4) Flash path with D % 128 != 0 (exercises the feature-dim padding).
    B3, S3, D3 = 2, 128, 96
    args3 = _make_inputs(k3, B3, S3, D3)
    ref3 = attention_layer_ref(*args3)
    out3 = jax.block_until_ready(attention_layer(*args3, block_q=64, block_k=64))
    assert out3.shape == (B3, S3, D3)
    err = float(jnp.max(jnp.abs(out3 - ref3)))
    assert err < 5e-2, f"padded flash path max abs err {err}"

    print("KERNEL_OK")
</pallas_src>

<mosaic_0001>
module attributes {stable_mosaic.version = 11 : i64} {
  func.func @_fused_attention_kernel(%arg0: i32, %arg1: memref<2x8x32xf32, #tpu.memory_space<vmem>>, %arg2: memref<32x96xf32, #tpu.memory_space<vmem>>, %arg3: memref<1x96xf32, #tpu.memory_space<vmem>>, %arg4: memref<2x8x32xf32, #tpu.memory_space<vmem>>) attributes {dimension_semantics = [#tpu.dimension_semantics<arbitrary>], iteration_bounds = array<i64: 1>, scalar_prefetch = 0 : i64, scratch_operands = 0 : i64, tpu.core_type = #tpu.core_type<tc>, window_params = [{pipeline_mode = #tpu.pipeline_mode<synchronous>, transform_indices = @transform_0, window_bounds = array<i64: 2, 8, 32>}, {pipeline_mode = #tpu.pipeline_mode<synchronous>, transform_indices = @transform_1, window_bounds = array<i64: 32, 96>}, {pipeline_mode = #tpu.pipeline_mode<synchronous>, transform_indices = @transform_2, window_bounds = array<i64: 1, 96>}, {pipeline_mode = #tpu.pipeline_mode<synchronous>, transform_indices = @transform_3, window_bounds = array<i64: 2, 8, 32>}]} {
    %c0 = arith.constant 0 : index
    %c0_0 = arith.constant 0 : index
    %c0_1 = arith.constant 0 : index
    %0 = vector.load %arg1[%c0, %c0_0, %c0_1] : memref<2x8x32xf32, #tpu.memory_space<vmem>>, vector<2x8x32xf32>
    %1 = vector.shape_cast %0 : vector<2x8x32xf32> to vector<16x32xf32>
    %c0_2 = arith.constant 0 : index
    %c0_3 = arith.constant 0 : index
    %2 = vector.load %arg2[%c0_2, %c0_3] : memref<32x96xf32, #tpu.memory_space<vmem>>, vector<32x96xf32>
    %cst = arith.constant dense<0.000000e+00> : vector<16x96xf32>
    %3 = tpu.matmul %1, %2, %cst {dimension_numbers = #tpu.dot_dimension_numbers<[1], [0], [0], [1], [0, 0, 1, 1], [], []>} : vector<16x32xf32>, vector<32x96xf32>, vector<16x96xf32> -> vector<16x96xf32>
    %c0_4 = arith.constant 0 : index
    %c0_5 = arith.constant 0 : index
    %4 = vector.load %arg3[%c0_4, %c0_5] : memref<1x96xf32, #tpu.memory_space<vmem>>, vector<1x96xf32>
    %5 = vector.broadcast %4 : vector<1x96xf32> to vector<16x96xf32>
    %6 = arith.addf %3, %5 : vector<16x96xf32>
    %7 = vector.shape_cast %6 : vector<16x96xf32> to vector<2x8x96xf32>
    %8 = vector.extract_strided_slice %7 {offsets = [0, 0, 0], sizes = [2, 8, 32], strides = [1, 1, 1]} : vector<2x8x96xf32> to vector<2x8x32xf32>
    %9 = vector.extract_strided_slice %7 {offsets = [0, 0, 32], sizes = [2, 8, 32], strides = [1, 1, 1]} : vector<2x8x96xf32> to vector<2x8x32xf32>
    %10 = vector.extract_strided_slice %7 {offsets = [0, 0, 64], sizes = [2, 8, 32], strides = [1, 1, 1]} : vector<2x8x96xf32> to vector<2x8x32xf32>
    %cst_6 = arith.constant dense<0.000000e+00> : vector<2x8x8xf32>
    %11 = tpu.matmul %8, %9, %cst_6 {dimension_numbers = #tpu.dot_dimension_numbers<[2], [2], [1], [1], [0, 0, 0, 1, 1, 1], [0], [0]>} : vector<2x8x32xf32>, vector<2x8x32xf32>, vector<2x8x8xf32> -> vector<2x8x8xf32>
    %cst_7 = arith.constant dense<0xFF800000> : vector<2x8xf32>
    %12 = vector.multi_reduction <maximumf>, %11, %cst_7 [2] : vector<2x8x8xf32> to vector<2x8xf32>
    %13 = vector.shape_cast %12 : vector<2x8xf32> to vector<2x8x1xf32>
    %14 = vector.broadcast %13 : vector<2x8x1xf32> to vector<2x8x8xf32>
    %15 = arith.subf %11, %14 : vector<2x8x8xf32>
    %16 = math.exp %15 : vector<2x8x8xf32>
    %cst_8 = arith.constant dense<0.000000e+00> : vector<2x8xf32>
    %17 = vector.multi_reduction <add>, %16, %cst_8 [2] : vector<2x8x8xf32> to vector<2x8xf32>
    %18 = vector.shape_cast %17 : vector<2x8xf32> to vector<2x8x1xf32>
    %19 = tpu.reciprocal %18 {approx = true} : vector<2x8x1xf32> -> vector<2x8x1xf32>
    %20 = arith.mulf %18, %19 : vector<2x8x1xf32>
    %cst_9 = arith.constant 2.000000e+00 : f32
    %21 = vector.broadcast %cst_9 : f32 to vector<2x8x1xf32>
    %22 = arith.subf %21, %20 : vector<2x8x1xf32>
    %23 = arith.mulf %19, %22 : vector<2x8x1xf32>
    %24 = vector.broadcast %23 : vector<2x8x1xf32> to vector<2x8x8xf32>
    %25 = arith.mulf %16, %24 : vector<2x8x8xf32>
    %cst_10 = arith.constant dense<0.000000e+00> : vector<2x8x32xf32>
    %26 = tpu.matmul %25, %10, %cst_10 {dimension_numbers = #tpu.dot_dimension_numbers<[2], [1], [1], [2], [0, 0, 0, 1, 1, 2], [0], [0]>} : vector<2x8x8xf32>, vector<2x8x32xf32>, vector<2x8x32xf32> -> vector<2x8x32xf32>
    %c0_11 = arith.constant 0 : index
    %c0_12 = arith.constant 0 : index
    %c0_13 = arith.constant 0 : index
    %27 = vector.load %arg4[%c0_11, %c0_12, %c0_13] : memref<2x8x32xf32, #tpu.memory_space<vmem>>, vector<2x8x32xf32>
    tpu.vector_store %arg4[%c0_11, %c0_12, %c0_13], %26 {strides = array<i32>} : memref<2x8x32xf32, #tpu.memory_space<vmem>>, vector<2x8x32xf32>,
    return
  }
  func.func @transform_0(%arg0: i32) -> (i32, i32, i32) {
    %c0_i32 = arith.constant 0 : i32
    %c0_i32_0 = arith.constant 0 : i32
    %c0_i32_1 = arith.constant 0 : i32
    %c0_i32_2 = arith.constant 0 : i32
    return %c0_i32, %c0_i32_0, %c0_i32_1 : i32, i32, i32
  }
  func.func @transform_1(%arg0: i32) -> (i32, i32) {
    %c0_i32 = arith.constant 0 : i32
    %c0_i32_0 = arith.constant 0 : i32
    %c0_i32_1 = arith.constant 0 : i32
    return %c0_i32, %c0_i32_0 : i32, i32
  }
  func.func @transform_2(%arg0: i32) -> (i32, i32) {
    %c0_i32 = arith.constant 0 : i32
    %c0_i32_0 = arith.constant 0 : i32
    %c0_i32_1 = arith.constant 0 : i32
    return %c0_i32, %c0_i32_0 : i32, i32
  }
  func.func @transform_3(%arg0: i32) -> (i32, i32, i32) {
    %c0_i32 = arith.constant 0 : i32
    %c0_i32_0 = arith.constant 0 : i32
    %c0_i32_1 = arith.constant 0 : i32
    %c0_i32_2 = arith.constant 0 : i32
    return %c0_i32, %c0_i32_0, %c0_i32_1 : i32, i32, i32
  }
}

</mosaic_0001>

<bundles_post_ra>
// kernel: tpu_custom_call.1
= control target key start
LH: loop header
LB: loop body
LE: loop exit
PB: predicated region body
PF: predicated region fallthrough
CT: control target
= control target key end

     0   :  { %8 = vsyncpa [#allocation3], 0  ;;  %s739_s0 = inlined_call_operand.hbm [shape: f32[2,8,32], index: 0, kind: input, shape index: {}]   ;;  %s740_s1 = inlined_call_operand.hbm [shape: f32[32,96], index: 1, kind: input, shape index: {}]   ;;  %s741_s2 = inlined_call_operand.vmem [shape: f32[1,96], index: 2, kind: input, shape index: {}]   ;;  %s742_s3 = inlined_call_operand.hbm [shape: f32[2,8,32], index: 3, kind: output, shape index: {}]  }
   0x1   :  { %9 = vsyncpa [#allocation6], 0 }
   0x2   :  { %10 = vsyncpa [#allocation4], 0  ;;  %s644_s12 = smov [#allocation2]   ;;  %s572_s16 = scalar_lea.hbm %s739_s0, 256 }
   0x3   :  { %s16_s13 = sshll.u32 %s644_s12, 4  ;;  %p573_p0 = scmp.ne.s32.totalorder %s739_s0, %s572_s16  ;;  %s17_s13 = int_to_ptr.vmem [resolvable:$true] %s16_s13 }
   0x4   :  { %p576_p1 = scmp.lt.u32.totalorder %s572_s16, %s739_s0 }
   0x6   :  { %p578_p2 = pnand %p576_p1, %p573_p0 }
   0x8   :  { %581 = shalt.err (!%p578_p2)
}
   0x9   :  { %s582_s21 = scalar_lea.vmem %s17_s13, 256  ;;  %p587_p4 = scmp.lt.s32.totalorder %s17_s13, %s17_s13 }
   0xa   :  { %p583_p3 = scmp.ne.s32.totalorder %s17_s13, %s582_s21  ;;  %p588_p5 = scmp.lt.s32.totalorder %s582_s21, %s582_s21 }
   0xc   :  { %p589_p6 = por %p588_p5, %p587_p4 }
   0xe   :  { %p590_p7 = pnand %p589_p6, %p583_p3 }
  0x10   :  { %593 = shalt.err (!%p590_p7)
}
  0x11   :  { %s645_s22 = smov 128   ;;  %s646_s23 = smov 8  }
  0x12   :  { %22 = dma.hbm_to_vmem [thread:$0]  %s739_s0, 256, %s17_s13, [#allocation3], %s645_s22, %s645_s22, %s646_s23  }
  0x13   :  { %s647_s26 = smov [#allocation5]   ;;  %s594_s30 = scalar_lea.hbm %s740_s1, 512 }
  0x14   :  { %s28_s27 = sshll.u32 %s647_s26, 4  ;;  %p595_p8 = scmp.ne.s32.totalorder %s740_s1, %s594_s30  ;;  %s29_s27 = int_to_ptr.vmem [resolvable:$true] %s28_s27 }
  0x15   :  { %p598_p9 = scmp.lt.u32.totalorder %s594_s30, %s740_s1 }
  0x17   :  { %p600_p10 = pnand %p598_p9, %p595_p8 }
  0x19   :  { %603 = shalt.err (!%p600_p10)
}
  0x1a   :  { %s604_s8 = scalar_lea.vmem %s29_s27, 512  ;;  %p609_p12 = scmp.lt.s32.totalorder %s29_s27, %s29_s27 }
  0x1b   :  { %p605_p11 = scmp.ne.s32.totalorder %s29_s27, %s604_s8  ;;  %p610_p13 = scmp.lt.s32.totalorder %s604_s8, %s604_s8 }
  0x1d   :  { %p611_p0 = por %p610_p13, %p609_p12 }
  0x1f   :  { %p612_p1 = pnand %p611_p0, %p605_p11 }
  0x21   :  { %615 = shalt.err (!%p612_p1)
}
  0x22   :  { %34 = dma.hbm_to_vmem [thread:$0]  %s740_s1, 512, %s29_s27, [#allocation6], %s645_s22, %s645_s22, %s646_s23  }
  0x23   :  { %638 = dma.done.wait [#allocation3], 256  }
  0x24   :  { %639 = vsyncadd [#allocation3], 4294967040 }
  0x25   :  { %640 = dma.done.wait [#allocation6], 512  }
  0x26   :  { %641 = vsyncadd [#allocation6], 4294966784  ;;  %vm56_vm0 = vcmask 261120   ;;  %v45_v0 = vld [vmem:[#allocation5] sm:$0xff]  ;;  %v46_v1 = vld [vmem:[#allocation5 + $0x8] sm:$0xff]  ;;  %v648_v8 = vmov 0.0  }
  0x27   :  { %v47_v2 = vld [vmem:[#allocation5 + $0x10] sm:$0xff]  ;;  %v547_v3 = vpack.c.bf16 %v46_v1, %v45_v0  ;;  %v48_v4 = vld [vmem:[#allocation5 + $0x18] sm:$0xff]  ;;  %527 = vmatprep.subr.mxu1 %v648_v8  ;;  %vm649_vm1 = vmmov 0   ;;  %s650_s11 = smov 96   ;;  %vm292_vm2 = vcmask 64512   ;;  %s652_s12 = smov [#allocation7]  }
  0x28   :  { %v43_v5 = vld [vmem:[#allocation2] sm:$0xff]  ;;  %v551_v6 = vpack.c.bf16 %v48_v4, %v47_v2  ;;  %v44_v7 = vld [vmem:[#allocation2 + $0x8] sm:$0xff]  ;;  %529 = vmatprep.mubr.msk.f32.mxu1 %vm649_vm1, %v648_v8  ;;  %s480_s13 = sshll.u32 %s652_s12, 4  ;;  %s481_s13 = int_to_ptr.vmem [resolvable:$true] %s480_s13 }
  0x29   :  { %524 = vmatprep.mubr.msk.f32.mxu0 %vm56_vm0, %v43_v5  ;;  %548 = vmatprep.subr.bf16.mxu0 %v547_v3  ;;  %v493_v9 = vld [vmem:[%s741_s2] ss:$0 sm:$0xff]  ;;  %s651_s2 = smov 64   ;;  %s616_s14 = scalar_lea.vmem %s481_s13, 256 }
  0x2a   :  { %550 = vmatpush3.bf16.msra.mxu0 %v547_v3  ;;  %p617_p2 = scmp.ne.s32.totalorder %s481_s13, %s616_s14  ;;  %p621_p3 = scmp.lt.s32.totalorder %s481_s13, %s481_s13 }
  0x2b   :  { %552 = vmatprep.subr.bf16.mxu0 %v551_v6  ;;  %p622_p4 = scmp.lt.s32.totalorder %s616_s14, %s616_s14 }
  0x2d   :  { %p623_p5 = por %p622_p4, %p621_p3 }
  0x2e   :  { %554 = vmatpush3.bf16.msra.mxu0 %v551_v6 }
  0x2f   :  { %537 = vmatprep.subr.mxu0 %v648_v8  ;;  %p624_p6 = pnand %p623_p5, %p617_p2 }
  0x31   :  { %525 = vmatmul.mubr.msk.f32.vlgmr.msra.gmra.mrb[0].mxu0 %vm56_vm0, %v44_v7 }
  0x32   :  { %539 = vmatprep.mubr.msk.f32.mxu0 %vm649_vm1, %v648_v8 }
 0x104   :  { %v526_v10 = vpop.f32.mrb[0].mxu0 }
 0x105   :  { %v129_v11 = vpop.f32.mrb[1].mxu0  ;;  %v135_v13 = vadd.f32 %v526_v10, %v493_v9 }
 0x106   :  { %v130_v12 = vadd.f32 %v493_v9, %v129_v11 }
 0x108   :  { %139 = vrot.lane.b32.xlu0 %v130_v12, %s650_s11 }
 0x10c   :  { %216 = vrot.lane.b32.xlu0 %v135_v13, %s650_s11 }
 0x17a   :  { %v140_v14 = vpop.permute.xlu0 %139 }
 0x17b   :  { %528 = vmatpush3.xpose.msk.msra.mxu1 %vm56_vm0, %v140_v14 }
 0x17c   :  { %532 = vmatprep.subr.mxu1 %v648_v8 }
 0x17e   :  { %530 = vmatmul.mubr.msk.f32.vlgmr.msra.gmra.mrb[0].mxu1 %vm56_vm0, %v130_v12  ;;  %v217_v15 = vpop.permute.xlu0 %216 }
 0x17f   :  { %533 = vmatpush3.xpose.msk.msra.mxu1 %vm56_vm0, %v217_v15  ;;  %534 = vmatprep.mubr.msk.f32.mxu1 %vm649_vm1, %v648_v8 }
 0x180   :  { %542 = vmatprep.subr.mxu1 %v648_v8 }
 0x182   :  { %535 = vmatmul.mubr.msk.f32.vlgmr.msra.gmra.mrb[2].mxu1 %vm56_vm0, %v135_v13 }
 0x183   :  { %544 = vmatprep.mubr.msk.f32.mxu1 %vm649_vm1, %v648_v8 }
 0x251   :  { %v211_v16 = vpop.f32.mrb[0].mxu1 }
 0x252   :  { %v531_v17 = vpop.f32.mrb[1].mxu1  ;;  %v293_v18 = vsel %vm292_vm2, %v211_v16, -inf }
 0x253   :  { %294 = vmax.xlane.f32.xlu1 %v293_v18 }
 0x255   :  { %v288_v19 = vpop.f32.mrb[2].mxu1 }
 0x256   :  { %v536_v20 = vpop.f32.mrb[3].mxu1  ;;  %v296_v21 = vsel %vm292_vm2, %v288_v19, -inf }
 0x257   :  { %297 = vmax.xlane.f32.xlu1 %v296_v21 }
 0x268   :  { %321 = vrot.lane.b32.xlu1 %v130_v12, %s651_s2 }
 0x2e0   :  { %v295_v22 = vpop.xlane.xlu1 %294 }
 0x2e1   :  { %v299_v23 = vsub.f32 %v211_v16, %v295_v22 }
 0x2e3   :  { %v301_v24 = vmul.f32 1.442695, %v299_v23 }
 0x2e4   :  { %v298_v25 = vpop.xlane.xlu1 %297 }
 0x2e5   :  { %564 = vpow2.f32 %v301_v24  ;;  %v300_v26 = vsub.f32 %v288_v19, %v298_v25 }
 0x2e7   :  { %v303_v27 = vmul.f32 1.442695, %v300_v26 }
 0x2e8   :  { %v322_v28 = vpop.permute.xlu1 %321 }
 0x2e9   :  { %566 = vpow2.f32 %v303_v27  ;;  %538 = vmatpush3.msra.mxu0 %v322_v28 }
 0x2ef   :  { %v565_v29 = vpop.eup %564 }
 0x2f0   :  { %v305_v30 = vsel %vm292_vm2, %v565_v29, 0.0 }
 0x2f1   :  { %306 = vadd.xlane.f32.xlu0 %v305_v30 }
 0x2f3   :  { %v567_v31 = vpop.eup %566 }
 0x2f4   :  { %v308_v32 = vsel %vm292_vm2, %v567_v31, 0.0 }
 0x2f5   :  { %309 = vadd.xlane.f32.xlu1 %v308_v32 }
 0x306   :  { %397 = vrot.lane.b32.xlu1 %v135_v13, %s651_s2 }
 0x37e   :  { %v307_v33 = vpop.xlane.xlu0 %306 }
 0x37f   :  { %568 = vrcp.f32 %v307_v33 }
 0x382   :  { %v310_v34 = vpop.xlane.xlu1 %309 }
 0x383   :  { %570 = vrcp.f32 %v310_v34 }
 0x386   :  { %v398_v35 = vpop.permute.xlu1 %397 }
 0x387   :  { %543 = vmatpush3.msra.mxu1 %v398_v35 }
 0x389   :  { %v569_v36 = vpop.eup %568 }
 0x38a   :  { %v313_v37 = vmul.f32 %v569_v36, %v307_v33 }
 0x38c   :  { %v315_v38 = vsub.f32 2.0, %v313_v37 }
 0x38d   :  { %v571_v39 = vpop.eup %570 }
 0x38e   :  { %v317_v40 = vmul.f32 %v569_v36, %v315_v38  ;;  %v314_v41 = vmul.f32 %v571_v39, %v310_v34 }
 0x390   :  { %v319_v42 = vmul.f32 %v565_v29, %v317_v40  ;;  %v316_v43 = vsub.f32 2.0, %v314_v41 }
 0x392   :  { %v318_v44 = vmul.f32 %v571_v39, %v316_v43  ;;  %540 = vmatmul.mubr.msk.f32.vlgmr.msra.gmra.mrb[2].mxu0 %vm292_vm2, %v319_v42 }
 0x394   :  { %v320_v45 = vmul.f32 %v567_v31, %v318_v44 }
 0x396   :  { %545 = vmatmul.mubr.msk.f32.vlgmr.msra.gmra.mrb[4].mxu1 %vm292_vm2, %v320_v45 }
 0x465   :  { %v393_v46 = vpop.f32.mrb[2].mxu0 }
 0x466   :  { %473 = vst.msk [vmem:[#allocation7] sm:$0xff] %vm56_vm0, %v393_v46  ;;  %v541_v47 = vpop.f32.mrb[3].mxu0 }
 0x469   :  { %v469_v48 = vpop.f32.mrb[4].mxu1 }
 0x46a   :  { %474 = vst.msk [vmem:[#allocation7 + $0x8] sm:$0xff] %vm56_vm0, %v469_v48  ;;  %v546_v49 = vpop.f32.mrb[5].mxu1 }
 0x46b   :  { %627 = shalt.err (!%p624_p6)
}
 0x46c   :  { %s628_s17 = scalar_lea.hbm %s742_s3, 256 }
 0x46d   :  { %p629_p7 = scmp.ne.s32.totalorder %s742_s3, %s628_s17  ;;  %p632_p8 = scmp.lt.u32.totalorder %s628_s17, %s742_s3 }
 0x46f   :  { %p634_p9 = pnand %p632_p8, %p629_p7 }
 0x471   :  { %637 = shalt.err (!%p634_p9)
}
 0x472   :  { %486 = dma.vmem_to_hbm [thread:$0]  %s481_s13, 256, %s742_s3, [#allocation4], %s645_s22, %s645_s22, %s646_s23  }
 0x473   :  { %642 = dma.done.wait [#allocation4], 256  }
 0x474   :  { %643 = vsyncadd [#allocation4], 4294967040 }
 0x475   :  { %490 = vsyncpa [#allocation3], 1 }
 0x476   :  { %491 = vsyncpa [#allocation6], 1 }
 0x477   :  { %492 = vsyncpa [#allocation4], 1 }

</bundles_post_ra>
